<compile_context>
chip_gen: v5e
topology: v5e:2x2
jax: 0.10.0
libtpu: 0.0.40
codegen_flags: <defaults>
</compile_context>

<pallas_src>
import functools

import jax
import jax.numpy as jnp
from jax.experimental import pallas as pl
from jax.experimental.pallas import tpu as pltpu

LANES = 128


# ----------------------------------------------------------------------------
# Host-side weight packing: one (rows, 128) f32 slab + static layout metadata
# ----------------------------------------------------------------------------
def pack_weight_slab(p, lanes=LANES):
    H = p["w12"].shape[0]
    OUT = p["wlin"].shape[1]

    wlin_pad = jnp.zeros((H, lanes), jnp.float32).at[:, :OUT].set(p["wlin"])
    blin_pad = jnp.zeros((1, lanes), jnp.float32).at[:, :OUT].set(p["blin"])

    entries = [
        # fused edge-embedding weights for both conv layers (single K=De matmul)
        ("wecat", jnp.concatenate([p["we1"], p["we2"]], axis=1)),
        ("becat", jnp.concatenate([p["be1"], p["be2"]], axis=1)),
        ("w11", p["w11"]), ("b11", p["b11"]),
        ("w12", p["w12"]), ("b12", p["b12"]),
        ("w21", p["w21"]), ("b21", p["b21"]),
        ("w22", p["w22"]), ("b22", p["b22"]),
        ("wlin", wlin_pad), ("blin", blin_pad),
    ]

    layout = {}
    blocks = []
    row = 0
    for name, a in entries:
        a = jnp.asarray(a, jnp.float32)
        r, c = a.shape
        layout[name] = (row, r, c)
        blocks.append(jnp.pad(a, ((0, 0), (0, lanes - c))))
        row += r
    slab = jnp.concatenate(blocks, axis=0)
    pad_rows = (-slab.shape[0]) % 8          # sublane-align the slab
    if pad_rows:
        slab = jnp.pad(slab, ((0, pad_rows), (0, 0)))
    return slab, layout


# ----------------------------------------------------------------------------
# Pallas kernel factory (layout / dims are static closure values)
# ----------------------------------------------------------------------------
def make_gine_kernel(layout, cin, hidden):
    def w(ref, name):
        r0, nr, nc = layout[name]
        return ref[r0:r0 + nr, 0:nc]          # static slice of the weight slab

    def kernel(src_ref, dst_ref, batch_ref, x_ref, ea_ref, w_ref, out_ref):
        f32 = jnp.float32
        dot = functools.partial(jnp.dot, preferred_element_type=f32)

        N = x_ref.shape[0]
        E = ea_ref.shape[0]
        Gn = out_ref.shape[0]

        x = x_ref[...]                        # (N, Cin)
        ea = ea_ref[...]                      # (E, De)

        # --- build gather / scatter / mean-pool masks in-register from indices ---
        gmask = (jax.lax.broadcasted_iota(jnp.int32, (E, N), 1)
                 == src_ref[...]).astype(f32)                 # (E, N): 1 at src[e]
        smask = (jax.lax.broadcasted_iota(jnp.int32, (N, E), 0)
                 == dst_ref[...]).astype(f32)                 # (N, E): 1 at dst[e]
        praw = (jax.lax.broadcasted_iota(jnp.int32, (Gn, N), 0)
                == batch_ref[...]).astype(f32)                # (Gn, N)
        counts = jnp.sum(praw, axis=1, keepdims=True)         # nodes per graph
        pmask = praw / jnp.maximum(counts, 1.0)               # mean-pool matrix

        # --- fused edge embedding for both layers (one small-K matmul) ---
        e_all = dot(ea, w(w_ref, "wecat")) + w(w_ref, "becat")   # (E, Cin+H)
        e1 = e_all[:, :cin]                                      # (E, Cin)
        e2 = e_all[:, cin:cin + hidden]                          # (E, H)

        # ---- GINEConv layer 1 ----
        xj1 = dot(gmask, x)                                      # gather x[src]
        msg1 = jnp.maximum(xj1 + e1, 0.0)
        agg1 = dot(smask, msg1)                                  # scatter-add
        h = x + agg1                                             # eps = 0
        h = jnp.maximum(dot(h, w(w_ref, "w11")) + w(w_ref, "b11"), 0.0)
        h1 = dot(h, w(w_ref, "w12")) + w(w_ref, "b12")           # (N, H)

        # ---- GINEConv layer 2 ----
        xj2 = dot(gmask, h1)
        msg2 = jnp.maximum(xj2 + e2, 0.0)
        agg2 = dot(smask, msg2)
        h2 = h1 + agg2
        h2 = jnp.maximum(dot(h2, w(w_ref, "w21")) + w(w_ref, "b21"), 0.0)
        h2 = dot(h2, w(w_ref, "w22")) + w(w_ref, "b22")          # (N, H)

        # ---- global mean pool + readout (lane-dense padded store) ----
        pooled = dot(pmask, h2)                                  # (Gn, H)
        out_ref[...] = dot(pooled, w(w_ref, "wlin")) + w(w_ref, "blin")  # (Gn, 128)

    return kernel


def gine_forward_pallas(x, edge_attr, src, dst, batch, n_graphs, params):
    N, Cin = x.shape
    E = edge_attr.shape[0]
    H = params["w12"].shape[0]
    OUT = params["wlin"].shape[1]

    slab, layout = pack_weight_slab(params, lanes=LANES)
    kernel = make_gine_kernel(layout, Cin, H)

    src_col = src.astype(jnp.int32).reshape(E, 1)
    dst_row = dst.astype(jnp.int32).reshape(1, E)
    batch_row = batch.astype(jnp.int32).reshape(1, N)

    vmem = lambda: pl.BlockSpec(memory_space=pltpu.MemorySpace.VMEM)
    args = (src_col, dst_row, batch_row,
            x.astype(jnp.float32), edge_attr.astype(jnp.float32), slab)

    out = pl.pallas_call(
        kernel,
        out_shape=jax.ShapeDtypeStruct((n_graphs, LANES), jnp.float32),
        in_specs=[vmem() for _ in args],
        out_specs=vmem(),
    )(*args)
    return out[:, :OUT]


# ----------------------------------------------------------------------------
# Pure-JAX reference (same math) for a correctness check
# ----------------------------------------------------------------------------
def gine_forward_ref(x, edge_attr, G, S, P, p):
    xj1 = G @ x
    msg1 = jax.nn.relu(xj1 + edge_attr @ p["we1"] + p["be1"])
    h = x + S @ msg1
    h1 = jax.nn.relu(h @ p["w11"] + p["b11"]) @ p["w12"] + p["b12"]
    xj2 = G @ h1
    msg2 = jax.nn.relu(xj2 + edge_attr @ p["we2"] + p["be2"])
    h2 = h1 + S @ msg2
    h2 = jax.nn.relu(h2 @ p["w21"] + p["b21"]) @ p["w22"] + p["b22"]
    return (P @ h2) @ p["wlin"] + p["blin"]


# ----------------------------------------------------------------------------
if __name__ == "__main__":
    key = jax.random.PRNGKey(0)

    # small graph batch: 2 graphs x 8 nodes, ring edges in both directions
    Cin, H, De, OUT = 4, 32, 3, 1
    NODES_PER_GRAPH = 8
    N_GRAPHS = 2
    N = N_GRAPHS * NODES_PER_GRAPH

    src_list, dst_list = [], []
    for g in range(N_GRAPHS):
        base = g * NODES_PER_GRAPH
        for i in range(NODES_PER_GRAPH):
            a, b = base + i, base + (i + 1) % NODES_PER_GRAPH
            src_list += [a, b]
            dst_list += [b, a]
    src = jnp.array(src_list, dtype=jnp.int32)
    dst = jnp.array(dst_list, dtype=jnp.int32)
    E = src.shape[0]                 # 32 edges
    batch = jnp.repeat(jnp.arange(N_GRAPHS, dtype=jnp.int32), NODES_PER_GRAPH)

    # deterministic inputs + parameters
    ks = jax.random.split(key, 16)
    x = jax.random.normal(ks[0], (N, Cin), dtype=jnp.float32)
    edge_attr = jax.random.normal(ks[1], (E, De), dtype=jnp.float32)

    def lin(k, fan_in, fan_out):
        bound = 1.0 / jnp.sqrt(fan_in)
        kw, kb = jax.random.split(k)
        w = jax.random.uniform(kw, (fan_in, fan_out), jnp.float32, -bound, bound)
        b = jax.random.uniform(kb, (1, fan_out), jnp.float32, -bound, bound)
        return w, b

    params = {}
    params["we1"], params["be1"] = lin(ks[2], De, Cin)    # GINEConv1 edge lin
    params["w11"], params["b11"] = lin(ks[3], Cin, H)     # mlp1.0
    params["w12"], params["b12"] = lin(ks[4], H, H)       # mlp1.2
    params["we2"], params["be2"] = lin(ks[5], De, H)      # GINEConv2 edge lin
    params["w21"], params["b21"] = lin(ks[6], H, H)       # mlp2.0
    params["w22"], params["b22"] = lin(ks[7], H, H)       # mlp2.2
    params["wlin"], params["blin"] = lin(ks[8], H, OUT)   # readout

    out = gine_forward_pallas(x, edge_attr, src, dst, batch, N_GRAPHS, params)
    out = jax.block_until_ready(out)

    # dense one-hot matrices only for the pure-JAX reference
    G = jax.nn.one_hot(src, N, dtype=jnp.float32)             # (E, N)
    S = jax.nn.one_hot(dst, N, dtype=jnp.float32).T           # (N, E)
    counts = jnp.bincount(batch, length=N_GRAPHS).astype(jnp.float32)
    P = jax.nn.one_hot(batch, N_GRAPHS, dtype=jnp.float32).T / counts[:, None]
    ref = gine_forward_ref(x, edge_attr, G, S, P, params)

    assert out.shape == (N_GRAPHS, OUT)
    assert jnp.allclose(out, ref, atol=1e-4, rtol=1e-4), (out, ref)

    print("KERNEL_OK")
</pallas_src>

<mosaic_0001>
module attributes {stable_mosaic.version = 11 : i64} {
  func.func @kernel(%arg0: memref<32x1xi32, #tpu.memory_space<vmem>>, %arg1: memref<1x32xi32, #tpu.memory_space<vmem>>, %arg2: memref<1x16xi32, #tpu.memory_space<vmem>>, %arg3: memref<16x4xf32, #tpu.memory_space<vmem>>, %arg4: memref<32x3xf32, #tpu.memory_space<vmem>>, %arg5: memref<144x128xf32, #tpu.memory_space<vmem>>, %arg6: memref<2x128xf32, #tpu.memory_space<vmem>>) attributes {dimension_semantics = [], scalar_prefetch = 0 : i64, scratch_operands = 0 : i64, tpu.core_type = #tpu.core_type<tc>} {
    %c0 = arith.constant 0 : index
    %c0_0 = arith.constant 0 : index
    %0 = vector.load %arg3[%c0, %c0_0] : memref<16x4xf32, #tpu.memory_space<vmem>>, vector<16x4xf32>
    %c0_1 = arith.constant 0 : index
    %c0_2 = arith.constant 0 : index
    %1 = vector.load %arg4[%c0_1, %c0_2] : memref<32x3xf32, #tpu.memory_space<vmem>>, vector<32x3xf32>
    %2 = tpu.iota {dimensions = array<i32: 1>} : vector<32x16xi32>
    %c0_3 = arith.constant 0 : index
    %c0_4 = arith.constant 0 : index
    %3 = vector.load %arg0[%c0_3, %c0_4] : memref<32x1xi32, #tpu.memory_space<vmem>>, vector<32x1xi32>
    %4 = vector.broadcast %3 : vector<32x1xi32> to vector<32x16xi32>
    %5 = arith.cmpi eq, %2, %4 : vector<32x16xi32>
    %6 = arith.extui %5 : vector<32x16xi1> to vector<32x16xi32>
    %7 = arith.sitofp %6 : vector<32x16xi32> to vector<32x16xf32>
    %8 = tpu.iota {dimensions = array<i32: 0>} : vector<16x32xi32>
    %c0_5 = arith.constant 0 : index
    %c0_6 = arith.constant 0 : index
    %9 = vector.load %arg1[%c0_5, %c0_6] : memref<1x32xi32, #tpu.memory_space<vmem>>, vector<1x32xi32>
    %10 = vector.broadcast %9 : vector<1x32xi32> to vector<16x32xi32>
    %11 = arith.cmpi eq, %8, %10 : vector<16x32xi32>
    %12 = arith.extui %11 : vector<16x32xi1> to vector<16x32xi32>
    %13 = arith.sitofp %12 : vector<16x32xi32> to vector<16x32xf32>
    %14 = tpu.iota {dimensions = array<i32: 0>} : vector<2x16xi32>
    %c0_7 = arith.constant 0 : index
    %c0_8 = arith.constant 0 : index
    %15 = vector.load %arg2[%c0_7, %c0_8] : memref<1x16xi32, #tpu.memory_space<vmem>>, vector<1x16xi32>
    %16 = vector.broadcast %15 : vector<1x16xi32> to vector<2x16xi32>
    %17 = arith.cmpi eq, %14, %16 : vector<2x16xi32>
    %18 = arith.extui %17 : vector<2x16xi1> to vector<2x16xi32>
    %19 = arith.sitofp %18 : vector<2x16xi32> to vector<2x16xf32>
    %cst = arith.constant dense<0.000000e+00> : vector<2xf32>
    %20 = vector.multi_reduction <add>, %19, %cst [1] : vector<2x16xf32> to vector<2xf32>
    %21 = vector.shape_cast %20 : vector<2xf32> to vector<2x1xf32>
    %cst_9 = arith.constant 1.000000e+00 : f32
    %22 = vector.broadcast %cst_9 : f32 to vector<2x1xf32>
    %23 = arith.maximumf %21, %22 : vector<2x1xf32>
    %24 = vector.broadcast %23 : vector<2x1xf32> to vector<2x16xf32>
    %25 = arith.divf %19, %24 : vector<2x16xf32>
    %c0_10 = arith.constant 0 : index
    %c0_11 = arith.constant 0 : index
    %26 = vector.load %arg5[%c0_10, %c0_11] : memref<144x128xf32, #tpu.memory_space<vmem>>, vector<3x36xf32>
    %cst_12 = arith.constant dense<0.000000e+00> : vector<32x36xf32>
    %27 = tpu.matmul %1, %26, %cst_12 {dimension_numbers = #tpu.dot_dimension_numbers<[1], [0], [0], [1], [0, 0, 1, 1], [], []>} : vector<32x3xf32>, vector<3x36xf32>, vector<32x36xf32> -> vector<32x36xf32>
    %c3 = arith.constant 3 : index
    %c0_13 = arith.constant 0 : index
    %28 = vector.load %arg5[%c3, %c0_13] : memref<144x128xf32, #tpu.memory_space<vmem>>, vector<1x36xf32>
    %29 = vector.broadcast %28 : vector<1x36xf32> to vector<32x36xf32>
    %30 = arith.addf %27, %29 : vector<32x36xf32>
    %31 = vector.extract_strided_slice %30 {offsets = [0, 0], sizes = [32, 4], strides = [1, 1]} : vector<32x36xf32> to vector<32x4xf32>
    %32 = vector.extract_strided_slice %30 {offsets = [0, 4], sizes = [32, 32], strides = [1, 1]} : vector<32x36xf32> to vector<32x32xf32>
    %cst_14 = arith.constant dense<0.000000e+00> : vector<32x4xf32>
    %33 = tpu.matmul %7, %0, %cst_14 {dimension_numbers = #tpu.dot_dimension_numbers<[1], [0], [0], [1], [0, 0, 1, 1], [], []>} : vector<32x16xf32>, vector<16x4xf32>, vector<32x4xf32> -> vector<32x4xf32>
    %34 = arith.addf %33, %31 : vector<32x4xf32>
    %cst_15 = arith.constant 0.000000e+00 : f32
    %35 = vector.broadcast %cst_15 : f32 to vector<32x4xf32>
    %36 = arith.maximumf %34, %35 : vector<32x4xf32>
    %cst_16 = arith.constant dense<0.000000e+00> : vector<16x4xf32>
    %37 = tpu.matmul %13, %36, %cst_16 {dimension_numbers = #tpu.dot_dimension_numbers<[1], [0], [0], [1], [0, 0, 1, 1], [], []>} : vector<16x32xf32>, vector<32x4xf32>, vector<16x4xf32> -> vector<16x4xf32>
    %38 = arith.addf %0, %37 : vector<16x4xf32>
    %c4 = arith.constant 4 : index
    %c0_17 = arith.constant 0 : index
    %39 = vector.load %arg5[%c4, %c0_17] : memref<144x128xf32, #tpu.memory_space<vmem>>, vector<4x32xf32>
    %cst_18 = arith.constant dense<0.000000e+00> : vector<16x32xf32>
    %40 = tpu.matmul %38, %39, %cst_18 {dimension_numbers = #tpu.dot_dimension_numbers<[1], [0], [0], [1], [0, 0, 1, 1], [], []>} : vector<16x4xf32>, vector<4x32xf32>, vector<16x32xf32> -> vector<16x32xf32>
    %c8 = arith.constant 8 : index
    %c0_19 = arith.constant 0 : index
    %41 = vector.load %arg5[%c8, %c0_19] : memref<144x128xf32, #tpu.memory_space<vmem>>, vector<1x32xf32>
    %42 = vector.broadcast %41 : vector<1x32xf32> to vector<16x32xf32>
    %43 = arith.addf %40, %42 : vector<16x32xf32>
    %cst_20 = arith.constant 0.000000e+00 : f32
    %44 = vector.broadcast %cst_20 : f32 to vector<16x32xf32>
    %45 = arith.maximumf %43, %44 : vector<16x32xf32>
    %c9 = arith.constant 9 : index
    %c0_21 = arith.constant 0 : index
    %46 = vector.load %arg5[%c9, %c0_21] : memref<144x128xf32, #tpu.memory_space<vmem>>, vector<32x32xf32>
    %cst_22 = arith.constant dense<0.000000e+00> : vector<16x32xf32>
    %47 = tpu.matmul %45, %46, %cst_22 {dimension_numbers = #tpu.dot_dimension_numbers<[1], [0], [0], [1], [0, 0, 1, 1], [], []>} : vector<16x32xf32>, vector<32x32xf32>, vector<16x32xf32> -> vector<16x32xf32>
    %c41 = arith.constant 41 : index
    %c0_23 = arith.constant 0 : index
    %48 = vector.load %arg5[%c41, %c0_23] : memref<144x128xf32, #tpu.memory_space<vmem>>, vector<1x32xf32>
    %49 = vector.broadcast %48 : vector<1x32xf32> to vector<16x32xf32>
    %50 = arith.addf %47, %49 : vector<16x32xf32>
    %cst_24 = arith.constant dense<0.000000e+00> : vector<32x32xf32>
    %51 = tpu.matmul %7, %50, %cst_24 {dimension_numbers = #tpu.dot_dimension_numbers<[1], [0], [0], [1], [0, 0, 1, 1], [], []>} : vector<32x16xf32>, vector<16x32xf32>, vector<32x32xf32> -> vector<32x32xf32>
    %52 = arith.addf %51, %32 : vector<32x32xf32>
    %cst_25 = arith.constant 0.000000e+00 : f32
    %53 = vector.broadcast %cst_25 : f32 to vector<32x32xf32>
    %54 = arith.maximumf %52, %53 : vector<32x32xf32>
    %cst_26 = arith.constant dense<0.000000e+00> : vector<16x32xf32>
    %55 = tpu.matmul %13, %54, %cst_26 {dimension_numbers = #tpu.dot_dimension_numbers<[1], [0], [0], [1], [0, 0, 1, 1], [], []>} : vector<16x32xf32>, vector<32x32xf32>, vector<16x32xf32> -> vector<16x32xf32>
    %56 = arith.addf %50, %55 : vector<16x32xf32>
    %c42 = arith.constant 42 : index
    %c0_27 = arith.constant 0 : index
    %57 = vector.load %arg5[%c42, %c0_27] : memref<144x128xf32, #tpu.memory_space<vmem>>, vector<32x32xf32>
    %cst_28 = arith.constant dense<0.000000e+00> : vector<16x32xf32>
    %58 = tpu.matmul %56, %57, %cst_28 {dimension_numbers = #tpu.dot_dimension_numbers<[1], [0], [0], [1], [0, 0, 1, 1], [], []>} : vector<16x32xf32>, vector<32x32xf32>, vector<16x32xf32> -> vector<16x32xf32>
    %c74 = arith.constant 74 : index
    %c0_29 = arith.constant 0 : index
    %59 = vector.load %arg5[%c74, %c0_29] : memref<144x128xf32, #tpu.memory_space<vmem>>, vector<1x32xf32>
    %60 = vector.broadcast %59 : vector<1x32xf32> to vector<16x32xf32>
    %61 = arith.addf %58, %60 : vector<16x32xf32>
    %cst_30 = arith.constant 0.000000e+00 : f32
    %62 = vector.broadcast %cst_30 : f32 to vector<16x32xf32>
    %63 = arith.maximumf %61, %62 : vector<16x32xf32>
    %c75 = arith.constant 75 : index
    %c0_31 = arith.constant 0 : index
    %64 = vector.load %arg5[%c75, %c0_31] : memref<144x128xf32, #tpu.memory_space<vmem>>, vector<32x32xf32>
    %cst_32 = arith.constant dense<0.000000e+00> : vector<16x32xf32>
    %65 = tpu.matmul %63, %64, %cst_32 {dimension_numbers = #tpu.dot_dimension_numbers<[1], [0], [0], [1], [0, 0, 1, 1], [], []>} : vector<16x32xf32>, vector<32x32xf32>, vector<16x32xf32> -> vector<16x32xf32>
    %c107 = arith.constant 107 : index
    %c0_33 = arith.constant 0 : index
    %66 = vector.load %arg5[%c107, %c0_33] : memref<144x128xf32, #tpu.memory_space<vmem>>, vector<1x32xf32>
    %67 = vector.broadcast %66 : vector<1x32xf32> to vector<16x32xf32>
    %68 = arith.addf %65, %67 : vector<16x32xf32>
    %cst_34 = arith.constant dense<0.000000e+00> : vector<2x32xf32>
    %69 = tpu.matmul %25, %68, %cst_34 {dimension_numbers = #tpu.dot_dimension_numbers<[1], [0], [0], [1], [0, 0, 1, 1], [], []>} : vector<2x16xf32>, vector<16x32xf32>, vector<2x32xf32> -> vector<2x32xf32>
    %c108 = arith.constant 108 : index
    %c0_35 = arith.constant 0 : index
    %70 = vector.load %arg5[%c108, %c0_35] : memref<144x128xf32, #tpu.memory_space<vmem>>, vector<32x128xf32>
    %cst_36 = arith.constant dense<0.000000e+00> : vector<2x128xf32>
    %71 = tpu.matmul %69, %70, %cst_36 {dimension_numbers = #tpu.dot_dimension_numbers<[1], [0], [0], [1], [0, 0, 1, 1], [], []>} : vector<2x32xf32>, vector<32x128xf32>, vector<2x128xf32> -> vector<2x128xf32>
    %c140 = arith.constant 140 : index
    %c0_37 = arith.constant 0 : index
    %72 = vector.load %arg5[%c140, %c0_37] : memref<144x128xf32, #tpu.memory_space<vmem>>, vector<1x128xf32>
    %73 = vector.broadcast %72 : vector<1x128xf32> to vector<2x128xf32>
    %74 = arith.addf %71, %73 : vector<2x128xf32>
    %c0_38 = arith.constant 0 : index
    %c0_39 = arith.constant 0 : index
    %75 = vector.load %arg6[%c0_38, %c0_39] : memref<2x128xf32, #tpu.memory_space<vmem>>, vector<2x128xf32>
    tpu.vector_store %arg6[%c0_38, %c0_39], %74 {strides = array<i32>} : memref<2x128xf32, #tpu.memory_space<vmem>>, vector<2x128xf32>,
    return
  }
}

</mosaic_0001>

<bundles_post_ra>
// kernel: tpu_custom_call.1
= control target key start
LH: loop header
LB: loop body
LE: loop exit
PB: predicated region body
PF: predicated region fallthrough
CT: control target
= control target key end

     0   :  { %11 = vsyncpa [#allocation3], 0  ;;  %s787_s0 = inlined_call_operand.vmem [shape: s32[32,1], index: 0, kind: input, shape index: {}]   ;;  %s788_s1 = inlined_call_operand.vmem [shape: s32[1,32], index: 1, kind: input, shape index: {}]   ;;  %s789_s2 = inlined_call_operand.vmem [shape: s32[1,16], index: 2, kind: input, shape index: {}]   ;;  %s790_s3 = inlined_call_operand.vmem [shape: f32[16,4], index: 3, kind: input, shape index: {}]   ;;  %s791_s4 = inlined_call_operand.vmem [shape: f32[32,3], index: 4, kind: input, shape index: {}]   ;;  %s792_s5 = inlined_call_operand.hbm [shape: f32[144,128], index: 5, kind: input, shape index: {}]   ;;  %s793_s6 = inlined_call_operand.hbm [shape: f32[2,128], index: 6, kind: output, shape index: {}]  }
   0x1   :  { %12 = vsyncpa [#allocation4], 0  ;;  %s27_s23 = sshll.u32 %s792_s5, 4  ;;  %s635_s24 = smov [#allocation2]   ;;  %s28_s23 = int_to_ptr.hbm [resolvable:$true] %s27_s23 }
   0x2   :  { %s29_s25 = sshll.u32 %s635_s24, 4  ;;  %s636_s26 = smov 128   ;;  %s30_s25 = int_to_ptr.vmem [resolvable:$true] %s29_s25 }
   0x3   :  { %s637_s27 = smov 8  }
   0x4   :  { %35 = dma.hbm_to_vmem [thread:$0]  %s28_s23, 2304, %s30_s25, [#allocation3], %s636_s26, %s636_s26, %s637_s27  }
   0x5   :  { %631 = dma.done.wait [#allocation3], 2304  }
   0x6   :  { %632 = vsyncadd [#allocation3], 4294964992  ;;  %v638_v0 = vmov 0   ;;  %vm128_vm0 = vcmask 1042432   ;;  %v48_v1 = vld [vmem:[%s787_s0] sm:$0xff]  ;;  %v50_v2 = vld [vmem:[%s787_s0 + $0x10] sm:$0xff]  ;;  %v46_v12 = vlaneseq }
   0x7   :  { %571 = vset.pattern.permute.xlu0 %v638_v0  ;;  %572 = vset.pattern.permute.xlu1 %v638_v0  ;;  %vm115_vm1 = vcmask 23552   ;;  %v112_v3 = vld [vmem:[#allocation2] sm:$0x7]  ;;  %v49_v5 = vld [vmem:[%s787_s0 + $0x8] sm:$0xff]  ;;  %v51_v6 = vld [vmem:[%s787_s0 + $0x18] sm:$0xff]  ;;  %vm161_vm2 = vcmask 130048  }
   0x8   :  { %53 = vperm.xlu0 %571, %v48_v1   ;;  %59 = vperm.xlu1 %572, %v50_v2   ;;  %v42_v4 = vld [vmem:[%s791_s4] sm:$0xff]  ;;  %v43_v7 = vld [vmem:[%s791_s4 + $0x8] sm:$0xff]  ;;  %v44_v9 = vld [vmem:[%s791_s4 + $0x10] sm:$0xff]  ;;  %v47_v13 = vand.u32 127, %v46_v12  ;;  %v639_v15 = vmov 0.0   ;;  %v740_v38 = vshrl.u32 %v46_v12, 7 }
   0x9   :  { %536 = vmatpush.msk.msra.mxu0 %vm128_vm0, %v112_v3  ;;  %v703_v8 = vld [vmem:[%s790_s3 + $0x8] sm:$0xff]  ;;  %v713_v10 = vld [vmem:[%s790_s3] sm:$0xff]  ;;  %v45_v11 = vld [vmem:[%s791_s4 + $0x18] sm:$0xff]  ;;  %s640_s3 = smov 124   ;;  %vm207_vm8 = vcmask 261120   ;;  %vm249_vm10 = vcmask 1043456  }
   0xa   :  { %537 = vmatmul.msk.f32.vlgmr.msra.gmra.mxu0 %vm115_vm1, %v42_v4  ;;  %188 = vmatpush.msra.mxu1 %v703_v8  ;;  %v573_v20 = vld [vmem:[#allocation2 + $0x3] ss:$0 sm:$0xff]  ;;  %v574_v39 = vld [vmem:[%s788_s1] ss:$0 sm:$0xff]  ;;  %v78_v47 = vadd.s32 8, %v740_v38  ;;  %vm242_vm11 = vcmask 31744  }
   0xb   :  { %vm81_vm7 = vcmp.eq.s32.totalorder %v740_v38, %v574_v39  ;;  %v239_v49 = vld [vmem:[#allocation2 + $0x4] sm:$0xf]  ;;  %v280_v55 = vld [vmem:[#allocation2 + $0x19] sm:$0xff]  ;;  %v279_v56 = vld [vmem:[#allocation2 + $0x11] sm:$0xff]  ;;  %vm92_vm13 = vcmask 123904   ;;  %s519_s27 = sshll.u32 %s793_s6, 4  ;;  %s520_s27 = int_to_ptr.hbm [resolvable:$true] %s519_s27 }
   0xc   :  { %189 = vmatpush.msra.mxu1 %v713_v10  ;;  %v747_v46 = vsel %vm81_vm7, 1.0, %v639_v15  ;;  %vm82_vm9 = vcmp.eq.s32.totalorder %v78_v47, %v574_v39  ;;  %547 = vmatpush.msk.msra.mxu3 %vm249_vm10, %v239_v49  ;;  %v281_v50 = vld [vmem:[#allocation2 + $0x21] sm:$0xff]  ;;  %v278_v57 = vld [vmem:[#allocation2 + $0x9] sm:$0xff] }
   0xd   :  { %v753_v48 = vsel %vm82_vm9, 1.0, %v639_v15  ;;  %v575_v58 = vld [vmem:[#allocation2 + $0x8] ss:$0 sm:$0xff]  ;;  %v576_v2 = vld [vmem:[#allocation2 + $0x29] ss:$0 sm:$0xff]  ;;  %v484_v47 = vld [vmem:[#allocation2 + $0x7c] sm:$0xff] }
   0xe   :  { %302 = vmatpush.msrb.mxu3 %v281_v50  ;;  %v577_v39 = vld [vmem:[#allocation2 + $0x4a] ss:$0 sm:$0xff] }
  0x10   :  { %56 = vperm.xlu0 %571, %v49_v5   ;;  %62 = vperm.xlu1 %572, %v51_v6  }
  0x11   :  { %303 = vmatpush.msrb.mxu3 %v280_v55 }
  0x12   :  { %538 = vmatmul.msk.f32.gmra.mxu0 %vm115_vm1, %v43_v7 }
  0x13   :  { %304 = vmatpush.msrb.mxu3 %v279_v56 }
  0x15   :  { %305 = vmatpush.msrb.mxu3 %v278_v57 }
  0x1a   :  { %539 = vmatmul.msk.f32.gmra.mxu0 %vm115_vm1, %v44_v9  ;;  %v389_v9 = vld [vmem:[#allocation2 + $0x3a] sm:$0xff] }
  0x22   :  { %540 = vmatmul.msk.f32.gmra.mxu0 %vm115_vm1, %v45_v11 }
  0x7a   :  { %v54_v14 = vpop.permute.xlu0 %53  ;;  %v60_v18 = vpop.permute.xlu1 %59 }
  0x7b   :  { %vm64_vm3 = vcmp.eq.s32.totalorder %v47_v13, %v54_v14  ;;  %vm66_vm5 = vcmp.eq.s32.totalorder %v47_v13, %v60_v18 }
  0x7c   :  { %v721_v16 = vsel %vm64_vm3, 1.0, %v639_v15  ;;  %v731_v23 = vsel %vm66_vm5, 1.0, %v639_v15 }
  0x7d   :  { %541 = vmatmul.msk.f32.vlgmr.msra.gmra.mxu1 %vm161_vm2, %v721_v16 }
  0x82   :  { %v57_v17 = vpop.permute.xlu0 %56  ;;  %v63_v24 = vpop.permute.xlu1 %62 }
  0x83   :  { %vm65_vm4 = vcmp.eq.s32.totalorder %v47_v13, %v57_v17  ;;  %vm67_vm6 = vcmp.eq.s32.totalorder %v47_v13, %v63_v24 }
  0x84   :  { %v726_v19 = vsel %vm65_vm4, 1.0, %v639_v15  ;;  %v736_v27 = vsel %vm67_vm6, 1.0, %v639_v15 }
  0x85   :  { %542 = vmatmul.msk.f32.gmra.mxu1 %vm161_vm2, %v726_v19 }
  0x87   :  { %v149_v21 = vpop.f32.mrf.mxu0 }
  0x88   :  { %v150_v22 = vadd.f32 %v573_v20, %v149_v21 }
  0x8a   :  { %317 = vrot.lane.b32.xlu1 %v150_v22, %s640_s3 }
  0x8d   :  { %543 = vmatmul.msk.f32.gmra.mxu1 %vm161_vm2, %v731_v23 }
  0x8f   :  { %v152_v25 = vpop.f32.mrf.mxu0 }
  0x90   :  { %v153_v26 = vadd.f32 %v573_v20, %v152_v25  ;;  %v388_v25 = vld [vmem:[#allocation2 + $0x32] sm:$0xff] }
  0x92   :  { %319 = vrot.lane.b32.xlu0 %v153_v26, %s640_s3 }
  0x95   :  { %544 = vmatmul.msk.f32.gmra.mxu1 %vm161_vm2, %v736_v27 }
  0x97   :  { %v155_v28 = vpop.f32.mrf.mxu0 }
  0x98   :  { %v156_v31 = vadd.f32 %v573_v20, %v155_v28 }
  0x9f   :  { %v158_v29 = vpop.f32.mrf.mxu0 }
  0xa0   :  { %v159_v30 = vadd.f32 %v573_v20, %v158_v29 }
  0xa2   :  { %323 = vrot.lane.b32.xlu2 %v159_v30, %s640_s3 }
  0xaa   :  { %321 = vrot.lane.b32.xlu2 %v156_v31, %s640_s3 }
  0xfa   :  { %v191_v32 = vpop.f32.mrf.mxu1 }
  0xfb   :  { %v192_v42 = vadd.f32 %v191_v32, %v150_v22  ;;  %v578_v32 = vld [vmem:[%s789_s2] ss:$0 sm:$0xff]  ;;  %s641_s2 = smov [#allocation5]  }
  0xfc   :  { %v318_v20 = vpop.permute.xlu1 %317  ;;  %vm89_vm12 = vcmp.eq.s32.totalorder %v740_v38, %v578_v32  ;;  %s517_s24 = sshll.u32 %s641_s2, 4  ;;  %s518_s24 = int_to_ptr.vmem [resolvable:$true] %s517_s24 }
  0xfd   :  { %v203_v45 = vmax.f32 %v192_v42, 0.0 }
 0x102   :  { %v194_v33 = vpop.f32.mrf.mxu1 }
 0x103   :  { %v195_v40 = vadd.f32 %v194_v33, %v153_v26  ;;  %v387_v26 = vld [vmem:[#allocation2 + $0x2a] sm:$0xff]  ;;  %v535_v33 = vsel %vm89_vm12, 1.0, %v639_v15 }
 0x104   :  { %v320_v17 = vpop.permute.xlu0 %319 }
 0x105   :  { %v204_v44 = vmax.f32 %v195_v40, 0.0 }
 0x10a   :  { %v197_v34 = vpop.f32.mrf.mxu1 }
 0x10b   :  { %v198_v36 = vadd.f32 %v197_v34, %v156_v31  ;;  %v93_v34 = vsel %vm92_vm13, %v535_v33, 0.0 }
 0x10c   :  { %94 = vadd.xlane.f32.xlu2 %v93_v34 }
 0x10d   :  { %v205_v43 = vmax.f32 %v198_v36, 0.0  ;;  %v425_v36 = vld [vmem:[#allocation2 + $0x53] sm:$0xff] }
 0x112   :  { %v200_v35 = vpop.f32.mrf.mxu1 }
 0x113   :  { %v201_v37 = vadd.f32 %v200_v35, %v159_v30  ;;  %v426_v35 = vld [vmem:[#allocation2 + $0x5b] sm:$0xff] }
 0x115   :  { %v206_v41 = vmax.f32 %v201_v37, 0.0  ;;  %v424_v37 = vld [vmem:[#allocation2 + $0x4b] sm:$0xff] }
 0x117   :  { %226 = vmatpush.msra.mxu2 %v206_v41 }
 0x119   :  { %227 = vmatpush.msra.mxu2 %v205_v43 }
 0x11b   :  { %228 = vmatpush.msra.mxu2 %v204_v44 }
 0x11d   :  { %229 = vmatpush.msra.mxu2 %v203_v45 }
 0x11e   :  { %545 = vmatmul.msk.f32.vlgmr.msra.gmra.mxu2 %vm207_vm8, %v747_v46 }
 0x126   :  { %546 = vmatmul.msk.f32.gmra.mxu2 %vm207_vm8, %v753_v48 }
 0x1a1   :  { %v231_v51 = vpop.f32.mrf.mxu2 }
 0x1a2   :  { %v237_v52 = vadd.f32 %v231_v51, %v713_v10  ;;  %v324_v10 = vpop.permute.xlu2 %323 }
 0x1a4   :  { %548 = vmatmul.msk.f32.vlgmr.msra.gmra.mxu3 %vm242_vm11, %v237_v52 }
 0x1a9   :  { %v234_v53 = vpop.f32.mrf.mxu2 }
 0x1aa   :  { %v238_v54 = vadd.f32 %v234_v53, %v703_v8  ;;  %v390_v8 = vld [vmem:[#allocation2 + $0x42] sm:$0xff]  ;;  %v322_v12 = vpop.permute.xlu2 %321 }
 0x1ab   :  { %411 = vmatpush.msra.mxu3 %v390_v8 }
 0x1ac   :  { %549 = vmatmul.msk.f32.gmra.mxu3 %vm242_vm11, %v238_v54 }
 0x1ad   :  { %412 = vmatpush.msra.mxu3 %v389_v9 }
 0x1af   :  { %413 = vmatpush.msra.mxu3 %v388_v25 }
 0x1b1   :  { %414 = vmatpush.msra.mxu3 %v387_v26 }
 0x1b2   :  { %v95_v15 = vpop.xlane.xlu2 %94 }
 0x1b3   :  { %v96_v45 = vmax.f32 %v95_v15, 1.0 }
 0x1b5   :  { %581 = vrcp.f32 %v96_v45  ;;  %vm102_vm14 = vweird.f32 %v96_v45  ;;  %v108_v54 = vand.u32 2147483648, %v96_v45  ;;  %v106_v56 = vand.u32 2147483647, %v96_v45 }
 0x1b7   :  { %v109_v57 = vor.u32 1.1754944e-38, %v108_v54  ;;  %vm107_vm1 = vcmp.eq.f32.partialorder %v106_v56, 8.507059e+37 }
 0x1bb   :  { %v582_v49 = vpop.eup %581 }
 0x1bc   :  { %v98_v50 = vmul.f32 %v582_v49, %v96_v45  ;;  %vm103_vm15 = vweird.f32 %v582_v49 }
 0x1bd   :  { %vm104_vm0 = vmor %vm102_vm14, %vm103_vm15 }
 0x1be   :  { %v99_v51 = vsub.f32 1.0, %v98_v50 }
 0x1c0   :  { %v100_v52 = vmul.f32 %v582_v49, %v99_v51 }
 0x1c2   :  { %v101_v55 = vadd.f32 %v582_v49, %v100_v52 }
 0x227   :  { %v270_v59 = vpop.f32.mrf.mxu3 }
 0x228   :  { %v271_v60 = vadd.f32 %v575_v58, %v270_v59  ;;  %v579_v59 = vld [vmem:[#allocation2 + $0x6b] ss:$0 sm:$0xff] }
 0x22a   :  { %v276_v61 = vmax.f32 %v271_v60, 0.0 }
 0x22c   :  { %550 = vmatmul.msk.f32.vlgmr.msrb.gmra.mxu3 %vm207_vm8, %v276_v61 }
 0x22f   :  { %v273_v62 = vpop.f32.mrf.mxu3 }
 0x230   :  { %v274_v63 = vadd.f32 %v575_v58, %v273_v62  ;;  %v105_v58 = vsel %vm104_vm0, %v582_v49, %v101_v55 }
 0x231   :  { %v110_v62 = vsel %vm107_vm1, %v109_v57, %v105_v58 }
 0x232   :  { %v277_v0 = vmax.f32 %v274_v63, 0.0 }
 0x234   :  { %551 = vmatmul.msk.f32.gmra.mxu3 %vm207_vm8, %v277_v0  ;;  %v111_v0 = vmul.f32 %v535_v33, %v110_v62 }
 0x2af   :  { %v307_v1 = vpop.f32.mrf.mxu3 }
 0x2b0   :  { %v308_v5 = vadd.f32 %v576_v2, %v307_v1  ;;  %v482_v1 = vld [vmem:[#allocation2 + $0x6c] sm:$0xff] }
 0x2b7   :  { %v310_v3 = vpop.f32.mrf.mxu3 }
 0x2b8   :  { %v311_v4 = vadd.f32 %v576_v2, %v310_v3  ;;  %v580_v3 = vld [vmem:[#allocation2 + $0x8c] ss:$0 sm:$0xff] }
 0x2ba   :  { %343 = vmatpush.msrb.mxu2 %v311_v4 }
 0x2bc   :  { %344 = vmatpush.msrb.mxu2 %v308_v5 }
 0x2bd   :  { %552 = vmatmul.msk.f32.vlgmr.msrb.gmra.mxu2 %vm161_vm2, %v721_v16 }
 0x2c5   :  { %553 = vmatmul.msk.f32.gmra.mxu2 %vm161_vm2, %v726_v19 }
 0x2cd   :  { %554 = vmatmul.msk.f32.gmra.mxu2 %vm161_vm2, %v731_v23 }
 0x2d5   :  { %555 = vmatmul.msk.f32.gmra.mxu2 %vm161_vm2, %v736_v27  ;;  %v427_v27 = vld [vmem:[#allocation2 + $0x63] sm:$0xff] }
 0x2d6   :  { %448 = vmatpush.msrb.mxu1 %v427_v27 }
 0x2d8   :  { %449 = vmatpush.msrb.mxu1 %v426_v35 }
 0x2da   :  { %450 = vmatpush.msrb.mxu1 %v425_v36 }
 0x2dc   :  { %451 = vmatpush.msrb.mxu1 %v424_v37 }
 0x340   :  { %v346_v6 = vpop.f32.mrf.mxu2 }
 0x341   :  { %v347_v21 = vadd.f32 %v346_v6, %v318_v20 }
 0x343   :  { %v358_v24 = vmax.f32 %v347_v21, 0.0 }
 0x348   :  { %v349_v7 = vpop.f32.mrf.mxu2 }
 0x349   :  { %v350_v18 = vadd.f32 %v349_v7, %v320_v17 }
 0x34b   :  { %v359_v23 = vmax.f32 %v350_v18, 0.0 }
 0x350   :  { %v352_v11 = vpop.f32.mrf.mxu2 }
 0x351   :  { %v353_v14 = vadd.f32 %v352_v11, %v322_v12 }
 0x353   :  { %v360_v22 = vmax.f32 %v353_v14, 0.0 }
 0x358   :  { %v355_v13 = vpop.f32.mrf.mxu2 }
 0x359   :  { %v356_v16 = vadd.f32 %v355_v13, %v324_v10 }
 0x35b   :  { %v361_v19 = vmax.f32 %v356_v16, 0.0 }
 0x35d   :  { %374 = vmatpush.msrb.mxu0 %v361_v19 }
 0x35f   :  { %375 = vmatpush.msrb.mxu0 %v360_v22 }
 0x361   :  { %376 = vmatpush.msrb.mxu0 %v359_v23 }
 0x363   :  { %377 = vmatpush.msrb.mxu0 %v358_v24 }
 0x364   :  { %556 = vmatmul.msk.f32.vlgmr.msrb.gmra.mxu0 %vm207_vm8, %v747_v46  ;;  %v485_v46 = vld [vmem:[#allocation2 + $0x84] sm:$0xff] }
 0x365   :  { %503 = vmatpush.msrb.mxu3 %v485_v46 }
 0x367   :  { %504 = vmatpush.msrb.mxu3 %v484_v47 }
 0x36c   :  { %557 = vmatmul.msk.f32.gmra.mxu0 %vm207_vm8, %v753_v48  ;;  %v483_v48 = vld [vmem:[#allocation2 + $0x74] sm:$0xff] }
 0x36d   :  { %505 = vmatpush.msrb.mxu3 %v483_v48 }
 0x36f   :  { %506 = vmatpush.msrb.mxu3 %v482_v1 }
 0x3e1   :  { %v379_v28 = vpop.f32.mrf.mxu0 }
 0x3e2   :  { %v385_v29 = vadd.f32 %v379_v28, %v308_v5 }
 0x3e4   :  { %558 = vmatmul.msk.f32.vlgmr.msra.gmra.mxu3 %vm207_vm8, %v385_v29 }
 0x3e9   :  { %v382_v30 = vpop.f32.mrf.mxu0 }
 0x3ea   :  { %v386_v31 = vadd.f32 %v382_v30, %v311_v4 }
 0x3ec   :  { %559 = vmatmul.msk.f32.gmra.mxu3 %vm207_vm8, %v386_v31 }
 0x467   :  { %v416_v40 = vpop.f32.mrf.mxu3 }
 0x468   :  { %v417_v41 = vadd.f32 %v577_v39, %v416_v40 }
 0x46a   :  { %v422_v42 = vmax.f32 %v417_v41, 0.0 }
 0x46c   :  { %560 = vmatmul.msk.f32.vlgmr.msrb.gmra.mxu1 %vm207_vm8, %v422_v42 }
 0x46f   :  { %v419_v43 = vpop.f32.mrf.mxu3 }
 0x470   :  { %v420_v44 = vadd.f32 %v577_v39, %v419_v43 }
 0x472   :  { %v423_v38 = vmax.f32 %v420_v44, 0.0 }
 0x474   :  { %561 = vmatmul.msk.f32.gmra.mxu1 %vm207_vm8, %v423_v38 }
 0x4e9   :  { %v453_v53 = vpop.f32.mrf.mxu1 }
 0x4ea   :  { %v454_v63 = vadd.f32 %v579_v59, %v453_v53 }
 0x4f1   :  { %v456_v60 = vpop.f32.mrf.mxu1 }
 0x4f2   :  { %v457_v61 = vadd.f32 %v579_v59, %v456_v60 }
 0x4f4   :  { %476 = vmatpush.msra.mxu0 %v457_v61 }
 0x4f6   :  { %477 = vmatpush.msra.mxu0 %v454_v63 }
 0x4f7   :  { %562 = vmatmul.msk.f32.vlgmr.msra.gmra.mxu0 %vm161_vm2, %v111_v0 }
 0x574   :  { %v479_v2 = vpop.f32.mrf.mxu0 }
 0x575   :  { %563 = vmatmul.msk.f32.vlgmr.msrb.gmra.mxu3 %vm207_vm8, %v479_v2 }
 0x5f8   :  { %v508_v4 = vpop.f32.mrf.mxu3 }
 0x5f9   :  { %v509_v5 = vadd.f32 %v580_v3, %v508_v4 }
 0x5fb   :  { %511 = vst [vmem:[#allocation5] sm:$0x3] %v509_v5 }
 0x5fc   :  { %522 = dma.vmem_to_hbm [thread:$0]  %s518_s24, 32, %s520_s27, [#allocation4]  }
 0x5fd   :  { %633 = dma.done.wait [#allocation4], 32  }
 0x5fe   :  { %634 = vsyncadd [#allocation4], 4294967264 }
 0x5ff   :  { %527 = vsyncpa [#allocation3], 1 }
 0x600   :  { %528 = vsyncpa [#allocation4], 1 }

</bundles_post_ra>
